<compile_context>
chip_gen: v7x
topology: tpu7x:2x2x1
jax: 0.10.0
libtpu: 0.0.40
codegen_flags: <defaults>
</compile_context>

<pallas_src>
import functools

import jax
import jax.numpy as jnp
from jax.experimental import pallas as pl
from jax.experimental.pallas import tpu as pltpu

_LANE = 128     # last-dim vreg tiling
_SUBLANE = 8    # second-to-last-dim vreg tiling (f32)


def _round_up(x: int, m: int) -> int:
    return (x + m - 1) // m * m


def _cdiv(a: int, b: int) -> int:
    return -(-a // b)


def _vmem_cap_bytes() -> int:
    """Scoped-VMEM cap derived from the physical VMEM of the current chip."""
    phys = 64 * 2**20  # conservative default (v7x per-TC VMEM)
    try:
        info = pltpu.get_tpu_info()
        phys = int(getattr(info, "vmem_capacity_bytes", phys))
    except Exception:
        pass
    # Leave headroom for compiler scratch: v7x (64 MiB) -> ~48 MiB,
    # v5e/v6e (128 MiB) -> 100 MiB.
    return int(min(100 * 2**20, max(32 * 2**20, phys - 16 * 2**20)))


def _pick_batch_tile(batch: int, max_tile: int) -> int:
    """8-aligned batch tile with low padding waste."""
    max_tile = max(_SUBLANE, _round_up(max_tile, _SUBLANE))
    if batch <= max_tile:
        tm = _round_up(batch, _SUBLANE)
    else:
        base = _cdiv(batch, max_tile)
        best_tm, best_waste = max_tile, None
        for n_tiles in range(base, base + 4):
            cand = _round_up(_cdiv(batch, n_tiles), _SUBLANE)
            waste = _cdiv(batch, cand) * cand - batch
            if best_waste is None or waste < best_waste:
                best_tm, best_waste = cand, waste
        tm = best_tm
    # Give the second TensorCore on v7x work when the batch would otherwise be
    # a single tile (no-op on single-TC v5e/v6e; weights stay VMEM-resident so
    # smaller tiles do not multiply weight traffic).
    if _round_up(batch, tm) == tm and tm >= 2 * _SUBLANE:
        tm = _round_up(tm // 2, _SUBLANE)
    return tm


def _fused_mlp_kernel(x_ref, w_in_ref, b_in_ref, w_hid_ref, b_hid_ref,
                      w_out_ref, b_out_ref, o_ref, act_ref,
                      *, n_layers: int, hidden_resident: bool):
    """One grid step = one layer applied to one batch tile.

    Grid = (num_batch_tiles, n_layers); the layer axis is innermost and carries
    the activation through the VMEM scratch `act_ref`.
    """
    layer = pl.program_id(1)

    # Layer 0: first linear (in_pad -> h_pad) + ReLU from the input tile.
    @pl.when(layer == 0)
    def _():
        y = jnp.dot(x_ref[...].astype(w_in_ref.dtype), w_in_ref[...],
                    preferred_element_type=jnp.float32)
        y = y + b_in_ref[...].astype(jnp.float32)
        act_ref[...] = jnp.maximum(y, 0.0)

    # Hidden layers 1 .. n_layers-2: (h_pad -> h_pad) + ReLU on the resident
    # activation.  Weights come from the VMEM-resident stack (dynamic index)
    # or from the per-layer streamed block in the fallback mode.
    @pl.when(jnp.logical_and(layer >= 1, layer <= n_layers - 2))
    def _():
        if hidden_resident:
            idx = jnp.clip(layer - 1, 0, w_hid_ref.shape[0] - 1)
        else:
            idx = 0
        w = w_hid_ref[idx]
        b = b_hid_ref[idx]
        y = jnp.dot(act_ref[...].astype(w.dtype), w,
                    preferred_element_type=jnp.float32)
        y = y + b.astype(jnp.float32)
        act_ref[...] = jnp.maximum(y, 0.0)

    # Last layer: (h_pad -> out_pad), no ReLU, write the output tile.
    @pl.when(layer == n_layers - 1)
    def _():
        y = jnp.dot(act_ref[...].astype(w_out_ref.dtype), w_out_ref[...],
                    preferred_element_type=jnp.float32)
        y = y + b_out_ref[...].astype(jnp.float32)
        o_ref[...] = y.astype(o_ref.dtype)


@functools.partial(jax.jit, static_argnames=("batch_tile", "n_hidden_layers"))
def fused_mlp(x_pad, w_in, b_in, w_hid, b_hid, w_out, b_out, *,
              batch_tile: int, n_hidden_layers: int):
    """x_pad: (B_pad, in_pad) -> (B_pad, out_pad)."""
    b_pad, in_pad = x_pad.shape
    h_pad = w_in.shape[1]
    out_pad = w_out.shape[1]
    n_layers = n_hidden_layers + 2
    assert b_pad % batch_tile == 0
    n_batch_tiles = b_pad // batch_tile
    grid = (n_batch_tiles, n_layers)

    x_bytes = jnp.dtype(x_pad.dtype).itemsize
    w_bytes = jnp.dtype(w_in.dtype).itemsize
    acc_bytes = 4  # f32 activation scratch

    n_hid_blocks = w_hid.shape[0]  # >= 1 (dummy block when n_hidden_layers == 0)
    hid_stack_bytes = n_hid_blocks * (h_pad * h_pad + h_pad) * w_bytes
    fixed_weight_bytes = (in_pad * h_pad + h_pad + h_pad * out_pad + out_pad) * w_bytes
    io_bytes = (2 * batch_tile * in_pad * x_bytes        # x tile (double-buffered)
                + 2 * batch_tile * out_pad * x_bytes     # out tile (double-buffered)
                + batch_tile * h_pad * acc_bytes)        # resident activation

    cap = _vmem_cap_bytes()
    # Resident path: constant index_map -> the whole stack is DMA'd once and
    # reused for every grid step.  Budget 2x in case the pipeline still
    # allocates double buffers for it.
    hidden_resident = (io_bytes + 2 * (fixed_weight_bytes + hid_stack_bytes)
                       <= int(0.75 * cap))

    if hidden_resident:
        vmem_needed = io_bytes + 2 * (fixed_weight_bytes + hid_stack_bytes)
        weight_hbm_bytes = fixed_weight_bytes + hid_stack_bytes
        hid_w_spec = pl.BlockSpec((n_hid_blocks, h_pad, h_pad),
                                  lambda m, l: (0, 0, 0))
        hid_b_spec = pl.BlockSpec((n_hid_blocks, 1, h_pad),
                                  lambda m, l: (0, 0, 0))
    else:
        # Fallback for very large hidden sizes: stream one hidden layer's
        # weights per grid step (re-streamed once per batch tile).
        per_layer_bytes = (h_pad * h_pad + h_pad) * w_bytes
        vmem_needed = io_bytes + 2 * fixed_weight_bytes + 2 * per_layer_bytes
        weight_hbm_bytes = fixed_weight_bytes + n_batch_tiles * hid_stack_bytes
        last_hid = max(n_hid_blocks - 1, 0)

        def hid_idx(m, l):
            return (jnp.clip(l - 1, 0, last_hid), 0, 0)

        hid_w_spec = pl.BlockSpec((1, h_pad, h_pad), hid_idx)
        hid_b_spec = pl.BlockSpec((1, 1, h_pad), hid_idx)

    vmem_limit = int(min(cap, max(32 * 2**20, vmem_needed + 8 * 2**20)))

    flops = 2 * b_pad * (in_pad * h_pad
                         + n_hidden_layers * h_pad * h_pad
                         + h_pad * out_pad)
    bytes_accessed = (b_pad * in_pad * x_bytes
                      + weight_hbm_bytes
                      + b_pad * out_pad * x_bytes)

    kernel = functools.partial(_fused_mlp_kernel, n_layers=n_layers,
                               hidden_resident=hidden_resident)

    return pl.pallas_call(
        kernel,
        out_shape=jax.ShapeDtypeStruct((b_pad, out_pad), x_pad.dtype),
        grid_spec=pltpu.PrefetchScalarGridSpec(
            num_scalar_prefetch=0,
            grid=grid,
            in_specs=[
                pl.BlockSpec((batch_tile, in_pad), lambda m, l: (m, 0)),  # x tile
                pl.BlockSpec((in_pad, h_pad), lambda m, l: (0, 0)),       # W_in (resident)
                pl.BlockSpec((1, h_pad), lambda m, l: (0, 0)),            # b_in
                hid_w_spec,                                               # hidden W stack
                hid_b_spec,                                               # hidden b stack
                pl.BlockSpec((h_pad, out_pad), lambda m, l: (0, 0)),      # W_out (resident)
                pl.BlockSpec((1, out_pad), lambda m, l: (0, 0)),          # b_out
            ],
            out_specs=pl.BlockSpec((batch_tile, out_pad), lambda m, l: (m, 0)),
            scratch_shapes=[pltpu.VMEM((batch_tile, h_pad), jnp.float32)],
        ),
        compiler_params=pltpu.CompilerParams(
            dimension_semantics=("parallel", "arbitrary"),
            vmem_limit_bytes=vmem_limit,
        ),
        cost_estimate=pl.CostEstimate(
            flops=int(flops), transcendentals=0,
            bytes_accessed=int(bytes_accessed)),
    )(x_pad, w_in, b_in, w_hid, b_hid, w_out, b_out)


class FullyConnectedPallas:
    """JAX/Pallas port of app/FC/FC_model.py::FullyConnected."""

    def __init__(self, latent_size: int, input_width: int, hidden_size: int,
                 n_hidden_layers: int, key, param_dtype=jnp.bfloat16):
        self.input_size = input_width * latent_size
        self.output_size = latent_size
        self.hidden_size = hidden_size
        self.n_hidden_layers = n_hidden_layers
        self.param_dtype = param_dtype

        dims = ([self.input_size] + [hidden_size] * (n_hidden_layers + 1)
                + [self.output_size])
        self.params = []
        for fan_in, fan_out in zip(dims[:-1], dims[1:]):
            key, kw, kb = jax.random.split(key, 3)
            bound = 1.0 / float(fan_in) ** 0.5
            # PyTorch nn.Linear default init: U(-1/sqrt(fan_in), 1/sqrt(fan_in)).
            # Stored (in, out) so the kernel computes y = x @ W + b.
            w = jax.random.uniform(kw, (fan_in, fan_out), jnp.float32, -bound, bound)
            b = jax.random.uniform(kb, (1, fan_out), jnp.float32, -bound, bound)
            self.params.append((w, b))

        # Lane-aligned, zero-padded parameter packing.  First/last layers keep
        # their own (narrow) padded widths; only hidden->hidden layers are
        # stacked into a uniform (L, h_pad, h_pad) stack.  Zero padding keeps
        # the math exact (padded lanes stay 0 through matmul, bias and ReLU).
        in_pad = _round_up(self.input_size, _LANE)
        h_pad = _round_up(hidden_size, _LANE)
        out_pad = _round_up(self.output_size, _LANE)
        self.in_pad, self.h_pad, self.out_pad = in_pad, h_pad, out_pad

        def pad2(a, rows, cols):
            out = jnp.zeros((rows, cols), param_dtype)
            return out.at[: a.shape[0], : a.shape[1]].set(a.astype(param_dtype))

        w0, b0 = self.params[0]
        wl, bl = self.params[-1]
        self.w_in = pad2(w0, in_pad, h_pad)
        self.b_in = pad2(b0, 1, h_pad)
        self.w_out = pad2(wl, h_pad, out_pad)
        self.b_out = pad2(bl, 1, out_pad)

        n_hid_blocks = max(n_hidden_layers, 1)  # keep >=1 block (dummy never used)
        w_hid = jnp.zeros((n_hid_blocks, h_pad, h_pad), param_dtype)
        b_hid = jnp.zeros((n_hid_blocks, 1, h_pad), param_dtype)
        for i in range(n_hidden_layers):
            w, b = self.params[1 + i]
            w_hid = w_hid.at[i, : w.shape[0], : w.shape[1]].set(w.astype(param_dtype))
            b_hid = b_hid.at[i, :, : b.shape[1]].set(b.astype(param_dtype))
        self.w_hid, self.b_hid = w_hid, b_hid

    def __call__(self, x, *, max_batch_tile: int = 512):
        batch = x.shape[0]
        tm = _pick_batch_tile(batch, max_batch_tile)
        b_pad = _round_up(batch, tm)
        x_pad = jnp.zeros((b_pad, self.in_pad), x.dtype)
        x_pad = x_pad.at[:batch, : self.input_size].set(x)
        y_pad = fused_mlp(x_pad, self.w_in, self.b_in, self.w_hid, self.b_hid,
                          self.w_out, self.b_out,
                          batch_tile=tm, n_hidden_layers=self.n_hidden_layers)
        return y_pad[:batch, : self.output_size].astype(x.dtype)


def reference_forward(params, x, compute_dtype=jnp.float32):
    """Plain-JAX reference (same dtype policy as the kernel: inputs cast to
    `compute_dtype` for each matmul, f32 accumulation)."""
    n = len(params)
    h = x
    for i, (w, b) in enumerate(params):
        h = jnp.dot(h.astype(compute_dtype), w.astype(compute_dtype),
                    preferred_element_type=jnp.float32)
        h = h + b.astype(compute_dtype).astype(jnp.float32)
        if i != n - 1:
            h = jnp.maximum(h, 0.0)
    return h


if __name__ == "__main__":
    # Small shapes consistent with the module: latent=4, input_width=8 -> input_size=32.
    latent_size = 4
    input_width = 8
    hidden_size = 32
    n_hidden_layers = 2
    batch = 2

    key = jax.random.PRNGKey(0)
    key, kmodel, kx = jax.random.split(key, 3)

    model = FullyConnectedPallas(latent_size, input_width, hidden_size,
                                 n_hidden_layers, kmodel)

    x = jax.random.normal(kx, (batch, input_width * latent_size), jnp.float32)

    y = jax.block_until_ready(model(x))

    y_ref = reference_forward(model.params, x, compute_dtype=model.param_dtype)
    assert y.shape == (batch, latent_size)
    max_err = float(jnp.max(jnp.abs(y - y_ref)))
    assert jnp.allclose(y, y_ref, atol=2e-2, rtol=2e-2), (
        f"mismatch vs reference, max abs err = {max_err}")

    print("KERNEL_OK")
</pallas_src>

<mosaic_0001>
module attributes {stable_mosaic.version = 11 : i64} {
  func.func @_fused_mlp_kernel(%arg0: i32, %arg1: i32, %arg2: memref<8x128xf32, #tpu.memory_space<vmem>>, %arg3: memref<128x128xbf16, #tpu.memory_space<vmem>>, %arg4: memref<1x128xbf16, #tpu.memory_space<vmem>>, %arg5: memref<2x128x128xbf16, #tpu.memory_space<vmem>>, %arg6: memref<2x1x128xbf16, #tpu.memory_space<vmem>>, %arg7: memref<128x128xbf16, #tpu.memory_space<vmem>>, %arg8: memref<1x128xbf16, #tpu.memory_space<vmem>>, %arg9: memref<8x128xf32, #tpu.memory_space<vmem>>, %arg10: memref<8x128xf32, #tpu.memory_space<vmem>>) attributes {dimension_semantics = [#tpu.dimension_semantics<parallel>, #tpu.dimension_semantics<arbitrary>], iteration_bounds = array<i64: 1, 4>, scalar_prefetch = 0 : i64, scratch_operands = 1 : i64, tpu.core_type = #tpu.core_type<tc>, window_params = [{transform_indices = @transform_0, window_bounds = array<i64: 8, 128>}, {pipeline_mode = #tpu.pipeline_mode<synchronous>, transform_indices = @transform_1, window_bounds = array<i64: 128, 128>}, {pipeline_mode = #tpu.pipeline_mode<synchronous>, transform_indices = @transform_2, window_bounds = array<i64: 1, 128>}, {pipeline_mode = #tpu.pipeline_mode<synchronous>, transform_indices = @transform_3, window_bounds = array<i64: 2, 128, 128>}, {pipeline_mode = #tpu.pipeline_mode<synchronous>, transform_indices = @transform_4, window_bounds = array<i64: 2, 1, 128>}, {pipeline_mode = #tpu.pipeline_mode<synchronous>, transform_indices = @transform_5, window_bounds = array<i64: 128, 128>}, {pipeline_mode = #tpu.pipeline_mode<synchronous>, transform_indices = @transform_6, window_bounds = array<i64: 1, 128>}, {transform_indices = @transform_7, window_bounds = array<i64: 8, 128>}]} {
    %c0_i32 = arith.constant 0 : i32
    %0 = arith.cmpi eq, %arg1, %c0_i32 : i32
    %1 = arith.extui %0 : i1 to i32
    %c0_i32_0 = arith.constant 0 : i32
    %2 = arith.cmpi ne, %1, %c0_i32_0 : i32
    scf.if %2 {
      %c0 = arith.constant 0 : index
      %c0_3 = arith.constant 0 : index
      %11 = vector.load %arg2[%c0, %c0_3] : memref<8x128xf32, #tpu.memory_space<vmem>>, vector<8x128xf32>
      %12 = arith.truncf %11 : vector<8x128xf32> to vector<8x128xbf16>
      %c0_4 = arith.constant 0 : index
      %c0_5 = arith.constant 0 : index
      %13 = vector.load %arg3[%c0_4, %c0_5] : memref<128x128xbf16, #tpu.memory_space<vmem>>, vector<128x128xbf16>
      %cst = arith.constant dense<0.000000e+00> : vector<8x128xf32>
      %14 = tpu.matmul %12, %13, %cst {dimension_numbers = #tpu.dot_dimension_numbers<[1], [0], [0], [1], [0, 0, 1, 1], [], []>} : vector<8x128xbf16>, vector<128x128xbf16>, vector<8x128xf32> -> vector<8x128xf32>
      %c0_6 = arith.constant 0 : index
      %c0_7 = arith.constant 0 : index
      %15 = vector.load %arg4[%c0_6, %c0_7] : memref<1x128xbf16, #tpu.memory_space<vmem>>, vector<1x128xbf16>
      %16 = arith.extf %15 : vector<1x128xbf16> to vector<1x128xf32>
      %17 = vector.broadcast %16 : vector<1x128xf32> to vector<8x128xf32>
      %18 = arith.addf %14, %17 : vector<8x128xf32>
      %cst_8 = arith.constant 0.000000e+00 : f32
      %19 = vector.broadcast %cst_8 : f32 to vector<8x128xf32>
      %20 = arith.maximumf %18, %19 : vector<8x128xf32>
      %c0_9 = arith.constant 0 : index
      %c0_10 = arith.constant 0 : index
      %21 = vector.load %arg10[%c0_9, %c0_10] : memref<8x128xf32, #tpu.memory_space<vmem>>, vector<8x128xf32>
      tpu.vector_store %arg10[%c0_9, %c0_10], %20 {strides = array<i32>} : memref<8x128xf32, #tpu.memory_space<vmem>>, vector<8x128xf32>,
    } else {
    }
    %c1_i32 = arith.constant 1 : i32
    %3 = arith.cmpi sge, %arg1, %c1_i32 : i32
    %c2_i32 = arith.constant 2 : i32
    %4 = arith.cmpi sle, %arg1, %c2_i32 : i32
    %5 = arith.andi %3, %4 : i1
    %6 = arith.extui %5 : i1 to i32
    %c0_i32_1 = arith.constant 0 : i32
    %7 = arith.cmpi ne, %6, %c0_i32_1 : i32
    scf.if %7 {
      %c1_i32_3 = arith.constant 1 : i32
      %11 = arith.subi %arg1, %c1_i32_3 : i32
      %c0_i32_4 = arith.constant 0 : i32
      %c1_i32_5 = arith.constant 1 : i32
      %12 = arith.maxsi %c0_i32_4, %11 : i32
      %13 = arith.minsi %c1_i32_5, %12 : i32
      %14 = arith.index_cast %13 : i32 to index
      %c0 = arith.constant 0 : index
      %c0_6 = arith.constant 0 : index
      %15 = vector.load %arg5[%14, %c0, %c0_6] : memref<2x128x128xbf16, #tpu.memory_space<vmem>>, vector<1x128x128xbf16>
      %16 = vector.shape_cast %15 : vector<1x128x128xbf16> to vector<128x128xbf16>
      %17 = arith.index_cast %13 : i32 to index
      %c0_7 = arith.constant 0 : index
      %c0_8 = arith.constant 0 : index
      %18 = vector.load %arg6[%17, %c0_7, %c0_8] : memref<2x1x128xbf16, #tpu.memory_space<vmem>>, vector<1x1x128xbf16>
      %19 = vector.shape_cast %18 : vector<1x1x128xbf16> to vector<1x128xbf16>
      %c0_9 = arith.constant 0 : index
      %c0_10 = arith.constant 0 : index
      %20 = vector.load %arg10[%c0_9, %c0_10] : memref<8x128xf32, #tpu.memory_space<vmem>>, vector<8x128xf32>
      %21 = arith.truncf %20 : vector<8x128xf32> to vector<8x128xbf16>
      %cst = arith.constant dense<0.000000e+00> : vector<8x128xf32>
      %22 = tpu.matmul %21, %16, %cst {dimension_numbers = #tpu.dot_dimension_numbers<[1], [0], [0], [1], [0, 0, 1, 1], [], []>} : vector<8x128xbf16>, vector<128x128xbf16>, vector<8x128xf32> -> vector<8x128xf32>
      %23 = arith.extf %19 : vector<1x128xbf16> to vector<1x128xf32>
      %24 = vector.broadcast %23 : vector<1x128xf32> to vector<8x128xf32>
      %25 = arith.addf %22, %24 : vector<8x128xf32>
      %cst_11 = arith.constant 0.000000e+00 : f32
      %26 = vector.broadcast %cst_11 : f32 to vector<8x128xf32>
      %27 = arith.maximumf %25, %26 : vector<8x128xf32>
      %c0_12 = arith.constant 0 : index
      %c0_13 = arith.constant 0 : index
      %28 = vector.load %arg10[%c0_12, %c0_13] : memref<8x128xf32, #tpu.memory_space<vmem>>, vector<8x128xf32>
      tpu.vector_store %arg10[%c0_12, %c0_13], %27 {strides = array<i32>} : memref<8x128xf32, #tpu.memory_space<vmem>>, vector<8x128xf32>,
    } else {
    }
    %c3_i32 = arith.constant 3 : i32
    %8 = arith.cmpi eq, %arg1, %c3_i32 : i32
    %9 = arith.extui %8 : i1 to i32
    %c0_i32_2 = arith.constant 0 : i32
    %10 = arith.cmpi ne, %9, %c0_i32_2 : i32
    scf.if %10 {
      %c0 = arith.constant 0 : index
      %c0_3 = arith.constant 0 : index
      %11 = vector.load %arg10[%c0, %c0_3] : memref<8x128xf32, #tpu.memory_space<vmem>>, vector<8x128xf32>
      %12 = arith.truncf %11 : vector<8x128xf32> to vector<8x128xbf16>
      %c0_4 = arith.constant 0 : index
      %c0_5 = arith.constant 0 : index
      %13 = vector.load %arg7[%c0_4, %c0_5] : memref<128x128xbf16, #tpu.memory_space<vmem>>, vector<128x128xbf16>
      %cst = arith.constant dense<0.000000e+00> : vector<8x128xf32>
      %14 = tpu.matmul %12, %13, %cst {dimension_numbers = #tpu.dot_dimension_numbers<[1], [0], [0], [1], [0, 0, 1, 1], [], []>} : vector<8x128xbf16>, vector<128x128xbf16>, vector<8x128xf32> -> vector<8x128xf32>
      %c0_6 = arith.constant 0 : index
      %c0_7 = arith.constant 0 : index
      %15 = vector.load %arg8[%c0_6, %c0_7] : memref<1x128xbf16, #tpu.memory_space<vmem>>, vector<1x128xbf16>
      %16 = arith.extf %15 : vector<1x128xbf16> to vector<1x128xf32>
      %17 = vector.broadcast %16 : vector<1x128xf32> to vector<8x128xf32>
      %18 = arith.addf %14, %17 : vector<8x128xf32>
      %c0_8 = arith.constant 0 : index
      %c0_9 = arith.constant 0 : index
      %19 = vector.load %arg9[%c0_8, %c0_9] : memref<8x128xf32, #tpu.memory_space<vmem>>, vector<8x128xf32>
      tpu.vector_store %arg9[%c0_8, %c0_9], %18 {strides = array<i32>} : memref<8x128xf32, #tpu.memory_space<vmem>>, vector<8x128xf32>,
    } else {
    }
    return
  }
  func.func @transform_0(%arg0: i32, %arg1: i32) -> (i32, i32) {
    %c0_i32 = arith.constant 0 : i32
    %c0_i32_0 = arith.constant 0 : i32
    return %arg0, %c0_i32 : i32, i32
  }
  func.func @transform_1(%arg0: i32, %arg1: i32) -> (i32, i32) {
    %c0_i32 = arith.constant 0 : i32
    %c0_i32_0 = arith.constant 0 : i32
    %c0_i32_1 = arith.constant 0 : i32
    return %c0_i32, %c0_i32_0 : i32, i32
  }
  func.func @transform_2(%arg0: i32, %arg1: i32) -> (i32, i32) {
    %c0_i32 = arith.constant 0 : i32
    %c0_i32_0 = arith.constant 0 : i32
    %c0_i32_1 = arith.constant 0 : i32
    return %c0_i32, %c0_i32_0 : i32, i32
  }
  func.func @transform_3(%arg0: i32, %arg1: i32) -> (i32, i32, i32) {
    %c0_i32 = arith.constant 0 : i32
    %c0_i32_0 = arith.constant 0 : i32
    %c0_i32_1 = arith.constant 0 : i32
    %c0_i32_2 = arith.constant 0 : i32
    return %c0_i32, %c0_i32_0, %c0_i32_1 : i32, i32, i32
  }
  func.func @transform_4(%arg0: i32, %arg1: i32) -> (i32, i32, i32) {
    %c0_i32 = arith.constant 0 : i32
    %c0_i32_0 = arith.constant 0 : i32
    %c0_i32_1 = arith.constant 0 : i32
    %c0_i32_2 = arith.constant 0 : i32
    return %c0_i32, %c0_i32_0, %c0_i32_1 : i32, i32, i32
  }
  func.func @transform_5(%arg0: i32, %arg1: i32) -> (i32, i32) {
    %c0_i32 = arith.constant 0 : i32
    %c0_i32_0 = arith.constant 0 : i32
    %c0_i32_1 = arith.constant 0 : i32
    return %c0_i32, %c0_i32_0 : i32, i32
  }
  func.func @transform_6(%arg0: i32, %arg1: i32) -> (i32, i32) {
    %c0_i32 = arith.constant 0 : i32
    %c0_i32_0 = arith.constant 0 : i32
    %c0_i32_1 = arith.constant 0 : i32
    return %c0_i32, %c0_i32_0 : i32, i32
  }
  func.func @transform_7(%arg0: i32, %arg1: i32) -> (i32, i32) {
    %c0_i32 = arith.constant 0 : i32
    %c0_i32_0 = arith.constant 0 : i32
    return %arg0, %c0_i32 : i32, i32
  }
}

</mosaic_0001>

<bundles_post_ra>
// kernel: fused_mlp.1
= control target key start
LH: loop header
LB: loop body
LE: loop exit
PB: predicated region body
PF: predicated region fallthrough
CT: control target
= control target key end

     0   :  { %12 = vsyncpa [#allocation4], 0  ;;  %s1466_s0 = inlined_call_operand.hbm [shape: f32[8,128], index: 0, kind: input, shape index: {}]   ;;  %s1467_s1 = inlined_call_operand.hbm [shape: bf16[128,128], index: 1, kind: input, shape index: {}]   ;;  %s1468_s2 = inlined_call_operand.vmem [shape: bf16[1,128], index: 2, kind: input, shape index: {}]   ;;  %s1469_s3 = inlined_call_operand.hbm [shape: bf16[2,128,128], index: 3, kind: input, shape index: {}]   ;;  %s1470_s4 = inlined_call_operand.vmem [shape: bf16[2,1,128], index: 4, kind: input, shape index: {}]   ;;  %s1471_s5 = inlined_call_operand.hbm [shape: bf16[128,128], index: 5, kind: input, shape index: {}]   ;;  %s1472_s6 = inlined_call_operand.vmem [shape: bf16[1,128], index: 6, kind: input, shape index: {}]   ;;  %s1473_s7 = inlined_call_operand.hbm [shape: f32[8,128], index: 7, kind: output, shape index: {}]  }
   0x1   :  { %13 = vsyncpa [#allocation7], 0 }
   0x2   :  { %14 = vsyncpa [#allocation10], 0 }
   0x3   :  { %15 = vsyncpa [#allocation5], 0  ;;  %s1258_s24 = smov 0   ;;  %s1260_s25 = smov 0  }
   0x4   :  { %s1262_s26 = smov 0  }
   0x5 LB: > { %s1205_s27 = smov [#allocation6]   ;;  %s1477_s29 = sadd.s32 4294967295, %s1203_s26   ;;  %s1203_s26 = sphi %s1262_s26, %s21_s26   ;;  %s1199_s25 = sphi %s1260_s25, %s1488_s25   ;;  %s1195_s24 = sphi %s1258_s24, %s1487_s24  }
   0x6   : > { %s241_s28 = sshll.u32 %s1205_s27, 4  ;;  %p785_p0 = scmp.ge.s32.totalorder %s1203_s26, 1  ;;  %s1282_s28 = int_to_ptr.vmem [resolvable:$true] %s241_s28 }
   0x7   : > { %p216_p1 = scmp.lt.s32.totalorder %s1203_s26, 5  ;;  %p1278_p2 = scmp.eq.s32.totalorder %s1477_s29, 0 }
   0x8   : > { %s30_s10 = sadd.s32 1, %s1199_s25  ;;  %s1206_s12 = smov [#allocation3]  }
   0x9   : > { %s1478_s30 = scalar_select %p1278_p2, 1, 0 }
   0xa   : > { %p1284_p3 = pnand %p785_p0, %p216_p1  ;;  %p1297_p6 = scmp.ge.s32.totalorder %s30_s10, 4 }
   0xb   : > { %s231_s13 = sshll.u32 %s1206_s12, 4  ;;  %s1027_s16 = scalar_lea.hbm %s1467_s1, 1024  ;;  %s232_s13 = int_to_ptr.vmem [resolvable:$true] %s231_s13 }
   0xc   : > { %s1479_s8 = scalar_select %p1284_p3, 1, 0 }
   0xd   : > { %p943_p4 = pneg %p1284_p3  ;;  %p1028_p7 = scmp.ne.s32.totalorder %s1467_s1, %s1027_s16 }
   0xe   : > { %p1034_p11 = scmp.lt.u32.totalorder %s1027_s16, %s1467_s1 }
   0xf   : > { %p1292_p5 = pnand %p1278_p2, %p943_p4 }
  0x11   : > { %p1309_p8 = pneg %p1292_p5 }
  0x13   : > { %p1030_p9 = pnand %p1309_p8, %p1028_p7 }
  0x15   : > { %p1031_p10 = pneg %p1030_p9 }
  0x17   : > { %p1036_p12 = pnand %p1034_p11, %p1031_p10 }
  0x19   : > { %1039 = shalt.err (!%p1036_p12)
}
  0x1a   : > { %s1040_s22 = scalar_lea.vmem %s1282_s28, 1024  ;;  %p1048_p4 = scmp.lt.s32.totalorder %s1282_s28, %s1282_s28 }
  0x1b   : > { %p1041_p13 = scmp.ne.s32.totalorder %s1282_s28, %s1040_s22  ;;  %p1049_p2 = scmp.lt.s32.totalorder %s1040_s22, %s1040_s22 }
  0x1d   : > { %p1043_p0 = pnand %p1041_p13, %p1309_p8  ;;  %p1050_p7 = por %p1049_p2, %p1048_p4 }
  0x1f   : > { %p1044_p1 = pneg %p1043_p0 }
  0x21   : > { %p1051_p9 = pnand %p1050_p7, %p1044_p1 }
  0x23   : > { %1054 = shalt.err (!%p1051_p9)
}
  0x24   : > { %s1207_s23 = smov 64   ;;  %s1208_s27 = smov 4  }
  0x25   : > { %949 = dma.hbm_to_vmem [thread:$0]  (!%p1292_p5), %s1467_s1, 1024, %s1282_s28, [#allocation7], %s1207_s23, %s1207_s23, %s1208_s27  }
  0x26   : > { %s1490_s10 = smov (%p1297_p6, %s30_s10), 0  ;;  %s1055_s17 = scalar_lea.hbm %s1466_s0, 128 }
  0x27   : > { %p1056_p2 = scmp.ne.s32.totalorder %s1466_s0, %s1055_s17  ;;  %p1062_p12 = scmp.lt.u32.totalorder %s1055_s17, %s1466_s0 }
  0x29   : > { %p1058_p10 = pnand %p1056_p2, %p1309_p8 }
  0x2b   : > { %p1059_p11 = pneg %p1058_p10 }
  0x2d   : > { %p1064_p13 = pnand %p1062_p12, %p1059_p11 }
  0x2f   : > { %1067 = shalt.err (!%p1064_p13)
}
  0x30   : > { %s1068_s28 = scalar_lea.vmem %s232_s13, 128  ;;  %p1076_p4 = scmp.lt.s32.totalorder %s232_s13, %s232_s13 }
  0x31   : > { %p1069_p6 = scmp.ne.s32.totalorder %s232_s13, %s1068_s28  ;;  %p1077_p7 = scmp.lt.s32.totalorder %s1068_s28, %s1068_s28 }
  0x33   : > { %p1071_p0 = pnand %p1069_p6, %p1309_p8  ;;  %p1078_p9 = por %p1077_p7, %p1076_p4 }
  0x35   : > { %p1072_p1 = pneg %p1071_p0 }
  0x37   : > { %p1079_p3 = pnand %p1078_p9, %p1072_p1 }
  0x39   : > { %1082 = shalt.err (!%p1079_p3)
}
  0x3a   : > { %946 = dma.hbm_to_vmem [thread:$0]  (!%p1292_p5), %s1466_s0, 128, %s232_s13, [#allocation4]  }
  0x3b   : > { %s1209_s14 = smov [#allocation8]   ;;  %s1210_s16 = smov [#allocation9]  }
  0x3c   : > { %s257_s15 = sshll.u32 %s1209_s14, 4  ;;  %s273_s17 = sshll.u32 %s1210_s16, 4  ;;  %s258_s15 = int_to_ptr.vmem [resolvable:$true] %s257_s15  ;;  %s274_s17 = int_to_ptr.vmem [resolvable:$true] %s273_s17 }
  0x3d   : > { %s1083_s21 = scalar_lea.hbm %s1469_s3, 2048 }
  0x3e   : > { %p1084_p3 = scmp.ne.s32.totalorder %s1469_s3, %s1083_s21  ;;  %p1090_p11 = scmp.lt.u32.totalorder %s1083_s21, %s1469_s3 }
  0x40   : > { %p1086_p2 = pnand %p1084_p3, %p1309_p8 }
  0x42   : > { %p1087_p10 = pneg %p1086_p2 }
  0x44   : > { %p1092_p12 = pnand %p1090_p11, %p1087_p10 }
  0x46   : > { %1095 = shalt.err (!%p1092_p12)
}
  0x47   : > { %s1096_s13 = scalar_lea.vmem %s258_s15, 2048  ;;  %p1104_p1 = scmp.lt.s32.totalorder %s258_s15, %s258_s15 }
  0x48   : > { %p1097_p13 = scmp.ne.s32.totalorder %s258_s15, %s1096_s13  ;;  %p1105_p4 = scmp.lt.s32.totalorder %s1096_s13, %s1096_s13 }
  0x4a   : > { %p1099_p6 = pnand %p1097_p13, %p1309_p8  ;;  %p1106_p7 = por %p1105_p4, %p1104_p1 }
  0x4c   : > { %p1100_p0 = pneg %p1099_p6 }
  0x4e   : > { %p1107_p9 = pnand %p1106_p7, %p1100_p0 }
  0x50   : > { %1110 = shalt.err (!%p1107_p9)
}
  0x51   : > { %952 = dma.hbm_to_vmem [thread:$0]  (!%p1292_p5), %s1469_s3, 2048, %s258_s15, [#allocation7], %s1207_s23, %s1207_s23, %s1208_s27  }
  0x52   : > { %s1111_s18 = scalar_lea.hbm %s1471_s5, 1024 }
  0x53   : > { %p1112_p3 = scmp.ne.s32.totalorder %s1471_s5, %s1111_s18  ;;  %p1118_p11 = scmp.lt.u32.totalorder %s1111_s18, %s1471_s5 }
  0x55   : > { %p1114_p2 = pnand %p1112_p3, %p1309_p8 }
  0x57   : > { %p1115_p10 = pneg %p1114_p2 }
  0x59   : > { %p1120_p12 = pnand %p1118_p11, %p1115_p10 }
  0x5b   : > { %1123 = shalt.err (!%p1120_p12)
}
  0x5c   : > { %s1124_s11 = scalar_lea.vmem %s274_s17, 1024  ;;  %p1132_p1 = scmp.lt.s32.totalorder %s274_s17, %s274_s17 }
  0x5d   : > { %p1125_p13 = scmp.ne.s32.totalorder %s274_s17, %s1124_s11  ;;  %p1133_p4 = scmp.lt.s32.totalorder %s1124_s11, %s1124_s11 }
  0x5f   : > { %p1127_p6 = pnand %p1125_p13, %p1309_p8  ;;  %p1134_p7 = por %p1133_p4, %p1132_p1 }
  0x61   : > { %p1128_p0 = pneg %p1127_p6 }
  0x63   : > { %p1135_p9 = pnand %p1134_p7, %p1128_p0 }
  0x65   : > { %1138 = shalt.err (!%p1135_p9)
}
  0x66   : > { %955 = dma.hbm_to_vmem [thread:$0]  (!%p1292_p5), %s1471_s5, 1024, %s274_s17, [#allocation10], %s1207_s23, %s1207_s23, %s1208_s27  }
  0x67   : > { %p1483_p3 = scmp.ne.s32.totalorder %s1479_s8, 0 }
  0x68   : > { %p1484_p8 = scmp.ne.s32.totalorder (!%p1483_p3), %s1478_s30, 0 }
  0x69   : > { %292 = sbr.rel (%p1483_p3) target bundleno = 906 (0x38a), region = 48 }
  0x70   : > { %1178 = dma.done.wait (%p1484_p8), [#allocation4], 128  }
  0x71   : > { %1180 = vsyncadd (%p1484_p8), [#allocation4], 4294967168 }
  0x72   : > { %1182 = dma.done.wait (%p1484_p8), [#allocation7], 3072  }
  0x73   : > { %1184 = vsyncadd (%p1484_p8), [#allocation7], 4294964224 }
  0x74   : > { %1186 = dma.done.wait (%p1484_p8), [#allocation10], 1024  }
  0x75   : > { %1188 = vsyncadd (%p1484_p8), [#allocation10], 4294966272  ;;  %p795_p5 = scmp.ne.s32.totalorder %s1195_s24, 0 }
  0x76   : > { %v1003_v0 = vld [vmem:[#allocation6] sm:$0xff] (!%p795_p5)   ;;  %v1211_v1 = vmov (!%p795_p5), 0.0   ;;  %v1004_v2 = vld [vmem:[#allocation6 + $0x8] sm:$0xff] (!%p795_p5)   ;;  %vm1212_vm0 = vmmov (!%p795_p5), 0   ;;  %v1005_v3 = vld [vmem:[#allocation6 + $0x10] sm:$0xff] (!%p795_p5)   ;;  %v351_v11 = vlaneseq (!%p795_p5) }
  0x77   : > { %330 = sbr.rel (%p795_p5) target bundleno = 368 (0x170), region = 68  ;;  %863 = vmatprep.subr.bf16.mxu0 (!%p795_p5), %v1211_v1  ;;  %879 = vmatprep.mubr.msk.bf16.mxu0 (!%p795_p5), %vm1212_vm0, %v1211_v1  ;;  %v1006_v4 = vld [vmem:[#allocation6 + $0x18] sm:$0xff] (!%p795_p5)   ;;  %v1007_v5 = vld [vmem:[#allocation6 + $0x20] sm:$0xff] (!%p795_p5)   ;;  %v1008_v6 = vld [vmem:[#allocation6 + $0x28] sm:$0xff] (!%p795_p5)  }
  0x78   : > { %864 = vmatpush3.bf16.msra.mxu0 (!%p795_p5), %v1003_v0  ;;  %v1009_v7 = vld [vmem:[#allocation6 + $0x30] sm:$0xff] (!%p795_p5)   ;;  %v1010_v8 = vld [vmem:[#allocation6 + $0x38] sm:$0xff] (!%p795_p5)   ;;  %v352_v12 = vshrl.u32 (!%p795_p5), %v351_v11, 7 }
  0x79   : > { %865 = vmatprep.subr.bf16.mxu0 (!%p795_p5), %v1211_v1  ;;  %v331_v9 = vld [vmem:[#allocation3] sm:$0xff] (!%p795_p5)  ;;  %v349_v13 = vld [vmem:[%s1468_s2] sm:$0x1] (!%p795_p5) }
  0x7a   : > { %v332_v10 = vpack.c.bf16 (!%p795_p5), %v331_v9, %v331_v9  ;;  %v350_v14 = vunpack.c.l.bf16 (!%p795_p5), %v349_v13  ;;  %v353_v15 = vsub.s32 (!%p795_p5), 0, %v352_v12 }
  0x7c   : > { %866 = vmatpush3.bf16.msra.mxu0 (!%p795_p5), %v1004_v2  ;;  %v354_v16 = vrot.slane (!%p795_p5), %v350_v14, %v353_v15 }
  0x7d   : > { %867 = vmatprep.subr.bf16.mxu0 (!%p795_p5), %v1211_v1 }
  0x80   : > { %868 = vmatpush3.bf16.msra.mxu0 %v1005_v3 }
  0x81   : > { %869 = vmatprep.subr.bf16.mxu0 %v1211_v1 }
  0x84   : > { %870 = vmatpush3.bf16.msra.mxu0 %v1006_v4 }
  0x85   : > { %871 = vmatprep.subr.bf16.mxu0 %v1211_v1 }
  0x88   : > { %872 = vmatpush3.bf16.msra.mxu0 %v1007_v5 }
  0x89   : > { %873 = vmatprep.subr.bf16.mxu0 %v1211_v1 }
  0x8c   : > { %874 = vmatpush3.bf16.msra.mxu0 %v1008_v6 }
  0x8d   : > { %875 = vmatprep.subr.bf16.mxu0 %v1211_v1 }
  0x90   : > { %876 = vmatpush3.bf16.msra.mxu0 %v1009_v7 }
  0x91   : > { %877 = vmatprep.subr.bf16.mxu0 %v1211_v1 }
  0x94   : > { %878 = vmatpush3.bf16.msra.mxu0 %v1010_v8 }
  0x97   : > { %880 = vmatmul.mubr.bf16.vlgmr.msra.gmra.mrb[0].mxu0 %v332_v10 }
 0x16a   : > { %v437_v17 = vpop.f32.mrb[0].mxu0 }
 0x16b   : > { %v438_v18 = vadd.f32 %v437_v17, %v354_v16  ;;  %v881_v19 = vpop.f32.mrb[1].mxu0 }
 0x16c   : > { %v440_v20 = vpop.f32.mrb[2].mxu0 }
 0x16d   : > { %v443_v21 = vmax.f32 %v438_v18, 0.0  ;;  %v882_v22 = vpop.f32.mrb[3].mxu0 }
 0x16f   : > { %444 = vst [vmem:[#allocation2] sm:$0xff] %v443_v21 }
 0x170 PF: > { %p445_p2 = scmp.ge.s32.totalorder %s1195_s24, 1  ;;  %p446_p10 = scmp.le.s32.totalorder %s1195_s24, 2 }
 0x172   : > { %p447_p11 = pnand %p446_p10, %p445_p2 }
 0x173   : > { %s804_s9 = sadd.s32 (!%p447_p11), 4294967295, %s1195_s24  ;;  %v1213_v23 = vmov (!%p447_p11), 0.0   ;;  %vm1214_vm1 = vmmov (!%p447_p11), 0   ;;  %v480_v34 = vlaneseq (!%p447_p11) }
 0x174   : > { %450 = sbr.rel (%p447_p11) target bundleno = 632 (0x278), region = 72  ;;  %883 = vmatprep.subr.bf16.mxu0 (!%p447_p11), %v1213_v23  ;;  %p452_p12 = scmp.gt.s32.totalorder (!%p447_p11), %s804_s9, 0  ;;  %899 = vmatprep.mubr.msk.bf16.mxu0 (!%p447_p11), %vm1214_vm1, %v1213_v23 }
 0x175   : > { %p805_p13 = scmp.lt.s32.totalorder (!%p447_p11), %s804_s9, 1  ;;  %v481_v35 = vshrl.u32 (!%p447_p11), %v480_v34, 7 }
 0x176   : > { %v477_v32 = vld [vmem:[#allocation2] sm:$0xff] (!%p447_p11) }
 0x177   : > { %v478_v33 = vpack.c.bf16 (!%p447_p11), %v477_v32, %v477_v32  ;;  %v482_v38 = vsub.s32 (!%p447_p11), 0, %v481_v35 }
 0x17b   : > { %s1492_s9 = smov (!%p452_p12, %s804_s9), 0 }
 0x17c   : > { %s1494_s9 = smov (!%p805_p13, %s1492_s9), 1 }
 0x17d   : > { %s835_s19 = sshll.u32 %s1494_s9, 6  ;;  %s475_s29 = scalar_lea.vmem %s1470_s4, %s1494_s9 }
 0x17e   : > { %s458_s23 = scalar_lea.vmem [#allocation8], %s835_s19  ;;  %v476_v36 = vld [vmem:[%s475_s29] sm:$0x1] }
 0x17f   : > { %v1011_v24 = vld [vmem:[%s458_s23] sm:$0xff]   ;;  %v1012_v25 = vld [vmem:[%s458_s23 + $0x8] sm:$0xff]   ;;  %v1013_v26 = vld [vmem:[%s458_s23 + $0x10] sm:$0xff]   ;;  %v479_v37 = vunpack.c.l.bf16 %v476_v36 }
 0x180   : > { %884 = vmatpush3.bf16.msra.mxu0 %v1011_v24  ;;  %v1014_v27 = vld [vmem:[%s458_s23 + $0x18] sm:$0xff]   ;;  %v1015_v28 = vld [vmem:[%s458_s23 + $0x20] sm:$0xff]   ;;  %v1016_v29 = vld [vmem:[%s458_s23 + $0x28] sm:$0xff]  }
 0x181   : > { %885 = vmatprep.subr.bf16.mxu0 %v1213_v23  ;;  %v1017_v30 = vld [vmem:[%s458_s23 + $0x30] sm:$0xff]   ;;  %v1018_v31 = vld [vmem:[%s458_s23 + $0x38] sm:$0xff]   ;;  %v483_v39 = vrot.slane %v479_v37, %v482_v38 }
 0x184   : > { %886 = vmatpush3.bf16.msra.mxu0 %v1012_v25 }
 0x185   : > { %887 = vmatprep.subr.bf16.mxu0 %v1213_v23 }
 0x188   : > { %888 = vmatpush3.bf16.msra.mxu0 %v1013_v26 }
 0x189   : > { %889 = vmatprep.subr.bf16.mxu0 %v1213_v23 }
 0x18c   : > { %890 = vmatpush3.bf16.msra.mxu0 %v1014_v27 }
 0x18d   : > { %891 = vmatprep.subr.bf16.mxu0 %v1213_v23 }
 0x190   : > { %892 = vmatpush3.bf16.msra.mxu0 %v1015_v28 }
 0x191   : > { %893 = vmatprep.subr.bf16.mxu0 %v1213_v23 }
 0x194   : > { %894 = vmatpush3.bf16.msra.mxu0 %v1016_v29 }
 0x195   : > { %895 = vmatprep.subr.bf16.mxu0 %v1213_v23 }
 0x198   : > { %896 = vmatpush3.bf16.msra.mxu0 %v1017_v30 }
 0x199   : > { %897 = vmatprep.subr.bf16.mxu0 %v1213_v23 }
 0x19c   : > { %898 = vmatpush3.bf16.msra.mxu0 %v1018_v31 }
 0x19f   : > { %900 = vmatmul.mubr.bf16.vlgmr.msra.gmra.mrb[0].mxu0 %v478_v33 }
 0x272   : > { %v566_v40 = vpop.f32.mrb[0].mxu0 }
 0x273   : > { %v567_v41 = vadd.f32 %v566_v40, %v483_v39  ;;  %v901_v42 = vpop.f32.mrb[1].mxu0 }
 0x274   : > { %v569_v43 = vpop.f32.mrb[2].mxu0 }
 0x275   : > { %v572_v44 = vmax.f32 %v567_v41, 0.0  ;;  %v902_v45 = vpop.f32.mrb[3].mxu0 }
 0x277   : > { %573 = vst [vmem:[#allocation2] sm:$0xff] %v572_v44 }
 0x278 PF: > { %p820_p6 = scmp.ne.s32.totalorder %s1195_s24, 3 }
 0x279   : > { %v1019_v46 = vld [vmem:[#allocation9] sm:$0xff] (!%p820_p6)   ;;  %v1215_v47 = vmov (!%p820_p6), 0.0   ;;  %v1020_v48 = vld [vmem:[#allocation9 + $0x8] sm:$0xff] (!%p820_p6)   ;;  %vm1216_vm2 = vmmov (!%p820_p6), 0   ;;  %v1021_v49 = vld [vmem:[#allocation9 + $0x10] sm:$0xff] (!%p820_p6)   ;;  %v598_v57 = vlaneseq (!%p820_p6) }
 0x27a   : > { %577 = sbr.rel (%p820_p6) target bundleno = 881 (0x371), region = 76  ;;  %903 = vmatprep.subr.bf16.mxu0 (!%p820_p6), %v1215_v47  ;;  %919 = vmatprep.mubr.msk.bf16.mxu0 (!%p820_p6), %vm1216_vm2, %v1215_v47  ;;  %v1022_v50 = vld [vmem:[#allocation9 + $0x18] sm:$0xff] (!%p820_p6)   ;;  %v1023_v51 = vld [vmem:[#allocation9 + $0x20] sm:$0xff] (!%p820_p6)   ;;  %v1024_v52 = vld [vmem:[#allocation9 + $0x28] sm:$0xff] (!%p820_p6)  }
 0x27b   : > { %904 = vmatpush3.bf16.msra.mxu0 (!%p820_p6), %v1019_v46  ;;  %v1025_v53 = vld [vmem:[#allocation9 + $0x30] sm:$0xff] (!%p820_p6)   ;;  %v1026_v54 = vld [vmem:[#allocation9 + $0x38] sm:$0xff] (!%p820_p6)   ;;  %v599_v58 = vshrl.u32 (!%p820_p6), %v598_v57, 7 }
 0x27c   : > { %905 = vmatprep.subr.bf16.mxu0 (!%p820_p6), %v1215_v47  ;;  %v596_v59 = vld [vmem:[%s1472_s6] sm:$0x1] (!%p820_p6) }
 0x27d   : > { %v597_v60 = vunpack.c.l.bf16 (!%p820_p6), %v596_v59  ;;  %v600_v61 = vsub.s32 (!%p820_p6), 0, %v599_v58 }
 0x27e   : > { %v578_v55 = vld [vmem:[#allocation2] sm:$0xff] (!%p820_p6) }
 0x27f   : > { %906 = vmatpush3.bf16.msra.mxu0 (!%p820_p6), %v1020_v48  ;;  %v579_v56 = vpack.c.bf16 (!%p820_p6), %v578_v55, %v578_v55  ;;  %v601_v62 = vrot.slane (!%p820_p6), %v597_v60, %v600_v61 }
 0x280   : > { %907 = vmatprep.subr.bf16.mxu0 (!%p820_p6), %v1215_v47 }
 0x283   : > { %908 = vmatpush3.bf16.msra.mxu0 %v1021_v49 }
 0x284   : > { %909 = vmatprep.subr.bf16.mxu0 %v1215_v47 }
 0x287   : > { %910 = vmatpush3.bf16.msra.mxu0 %v1022_v50 }
 0x288   : > { %911 = vmatprep.subr.bf16.mxu0 %v1215_v47 }
 0x28b   : > { %912 = vmatpush3.bf16.msra.mxu0 %v1023_v51 }
 0x28c   : > { %913 = vmatprep.subr.bf16.mxu0 %v1215_v47 }
 0x28f   : > { %914 = vmatpush3.bf16.msra.mxu0 %v1024_v52 }
 0x290   : > { %915 = vmatprep.subr.bf16.mxu0 %v1215_v47 }
 0x293   : > { %916 = vmatpush3.bf16.msra.mxu0 %v1025_v53 }
 0x294   : > { %917 = vmatprep.subr.bf16.mxu0 %v1215_v47 }
 0x297   : > { %918 = vmatpush3.bf16.msra.mxu0 %v1026_v54 }
 0x29a   : > { %920 = vmatmul.mubr.bf16.vlgmr.msra.gmra.mrb[0].mxu0 %v579_v56 }
 0x36d   : > { %v684_v63 = vpop.f32.mrb[0].mxu0 }
 0x36e   : > { %v685_v0 = vadd.f32 %v684_v63, %v601_v62  ;;  %v921_v1 = vpop.f32.mrb[1].mxu0 }
 0x36f   : > { %v687_v2 = vpop.f32.mrb[2].mxu0 }
 0x370   : > { %690 = vst [vmem:[#allocation11] sm:$0xff] %v685_v0  ;;  %v922_v3 = vpop.f32.mrb[3].mxu0 }
 0x371 PF: > { %s1485_s14 = sadd.s32 4294967295, %s1203_s26   ;;  %s1217_s18 = smov [#allocation11]  }
 0x372   : > { %p1431_p0 = scmp.eq.s32.totalorder %s1485_s14, 3  ;;  %s700_s20 = sshll.u32 %s1217_s18, 4  ;;  %s701_s20 = int_to_ptr.vmem [resolvable:$true] %s700_s20 }
 0x373   : > { %s1139_s21 = scalar_lea.vmem %s701_s20, 128  ;;  %p1146_p9 = scmp.lt.s32.totalorder %s701_s20, %s701_s20 }
 0x374   : > { %p1140_p1 = scmp.ne.s32.totalorder %s701_s20, %s1139_s21  ;;  %p1147_p3 = scmp.lt.s32.totalorder %s1139_s21, %s1139_s21 }
 0x376   : > { %p1141_p4 = pnand %p1140_p1, %p1431_p0  ;;  %p1148_p8 = por %p1147_p3, %p1146_p9 }
 0x378   : > { %p1142_p7 = pneg %p1141_p4 }
 0x37a   : > { %p1149_p5 = pnand %p1148_p8, %p1142_p7 }
 0x37c   : > { %1152 = shalt.err (!%p1149_p5)
}
 0x37d   : > { %s1153_s11 = scalar_lea.hbm %s1473_s7, 128 }
 0x37e   : > { %p1154_p2 = scmp.ne.s32.totalorder %s1473_s7, %s1153_s11  ;;  %p1159_p12 = scmp.lt.u32.totalorder %s1153_s11, %s1473_s7 }
 0x380   : > { %p1155_p10 = pnand %p1154_p2, %p1431_p0 }
 0x382   : > { %p1156_p11 = pneg %p1155_p10 }
 0x384   : > { %p1161_p13 = pnand %p1159_p12, %p1156_p11 }
 0x386   : > { %1164 = shalt.err (!%p1161_p13)
}
 0x387   : > { %940 = dma.vmem_to_hbm [thread:$0]  (%p1431_p0), %s701_s20, 128, %s1473_s7, [#allocation5]  }
 0x388   : > { %1190 = dma.done.wait (%p1431_p0), [#allocation5], 128  }
 0x389   : > { %1192 = vsyncadd (%p1431_p0), [#allocation5], 4294967168 }
 0x38a PF: > { %s21_s26 = sadd.s32 1, %s1203_s26   ;;  %s1487_s24 = smov %s1199_s25 }
 0x38b   : > { %p18_p6 = scmp.ge.s32.totalorder %s21_s26, 6   ;;  %s1488_s25 = smov %s1490_s10 }
 0x38d   :  { %20 = sbr.rel (!%p18_p6) target bundleno = 5 (0x5), region = 105 }
 0x394   :  { %713 = vsyncpa [#allocation4], 1 }
 0x395   :  { %715 = vsyncpa [#allocation4 + $0x1], 1 }
 0x396   :  { %716 = vsyncpa [#allocation7], 1 }
 0x397   :  { %717 = vsyncpa [#allocation10], 1 }
 0x398   :  { %718 = vsyncpa [#allocation5], 1 }
 0x399   :  { %720 = vsyncpa [#allocation5 + $0x1], 1 }

</bundles_post_ra>
